<compile_context>
chip_gen: v7x
topology: tpu7x:2x2x1
jax: 0.10.0
libtpu: 0.0.40
codegen_flags: <defaults>
</compile_context>

<pallas_src>
import jax
import jax.numpy as jnp
from jax import lax
from jax.experimental import pallas as pl
from jax.experimental.pallas import tpu as pltpu

RMS_EPS = 1e-5
VMEM_LIMIT_BYTES = 48 * 1024 * 1024  # fits v7x (64 MiB) with headroom; << v5e/v6e 128 MiB


# ----------------------------------------------------------------------------
# Fused Pallas kernel: RMSNorm + new_lm_head + og_lm_head + masked-KL reduction
# ----------------------------------------------------------------------------
def _fused_heads_kl_kernel(xe_ref, xl_ref, g_ref, wn_ref, wo_ref, mask_ref,
                           logits_ref, og_ref, kl_ref,
                           xen, xln, m_og, s_og, t_og, m_new, s_new):
    """Grid = (M//tile_m, V//tile_v); V (axis 1) is the inner 'arbitrary' axis.

    xe_ref : (tile_m, D) f32  early-exit activations (pre-norm)
    xl_ref : (tile_m, D) f32  last hidden state (already final-normed)
    g_ref  : (1, D)      f32  final-norm gamma
    wn_ref : (D, tile_v) bf16 new_lm_head weight tile
    wo_ref : (D, tile_v) bf16 og_lm_head weight tile
    mask_ref:(tile_m, 1) f32  kl_loss_mask
    """
    j = pl.program_id(1)

    # Normalize / cast the activation tile ONCE per M tile, reset online stats.
    @pl.when(j == 0)
    def _():
        xe = xe_ref[...].astype(jnp.float32)
        var = jnp.mean(xe * xe, axis=-1, keepdims=True)
        xen[...] = (xe * lax.rsqrt(var + RMS_EPS) * g_ref[...]).astype(jnp.bfloat16)
        xln[...] = xl_ref[...].astype(jnp.bfloat16)
        m_og[...] = jnp.full_like(m_og, -jnp.inf)
        s_og[...] = jnp.zeros_like(s_og)
        t_og[...] = jnp.zeros_like(t_og)
        m_new[...] = jnp.full_like(m_new, -jnp.inf)
        s_new[...] = jnp.zeros_like(s_new)

    # bf16 MXU matmuls, f32 accumulation.
    new = jnp.dot(xen[...], wn_ref[...], preferred_element_type=jnp.float32)
    og = jnp.dot(xln[...], wo_ref[...], preferred_element_type=jnp.float32)
    logits_ref[...] = new
    og_ref[...] = og

    # Online stats for og head: row max, sum(exp), sum(exp * (og - new)).
    mo = jnp.maximum(m_og[...], jnp.max(og, axis=-1, keepdims=True))
    a = jnp.exp(m_og[...] - mo)
    p = jnp.exp(og - mo)
    s_og[...] = a * s_og[...] + jnp.sum(p, axis=-1, keepdims=True)
    t_og[...] = a * t_og[...] + jnp.sum(p * (og - new), axis=-1, keepdims=True)
    m_og[...] = mo

    # Online logsumexp for new head.
    mn = jnp.maximum(m_new[...], jnp.max(new, axis=-1, keepdims=True))
    b = jnp.exp(m_new[...] - mn)
    s_new[...] = b * s_new[...] + jnp.sum(jnp.exp(new - mn), axis=-1, keepdims=True)
    m_new[...] = mn

    # Finalize: per-token masked KL.
    #   KL_row = sum_v exp(og_lp) * (og_lp - new_lp)
    #          = t_og / s_og - lse_og + lse_new
    @pl.when(j == pl.num_programs(1) - 1)
    def _():
        lse_og = m_og[...] + jnp.log(s_og[...])
        lse_new = m_new[...] + jnp.log(s_new[...])
        kl = t_og[...] / s_og[...] - lse_og + lse_new          # (tile_m, 1)
        kl_ref[...] = kl * mask_ref[...]


def pallas_fused_heads_kl(early2d, last2d, gamma, w_new, w_og, mask2d,
                          *, tile_m=128, tile_v=512):
    """Returns (logits[M,V] f32, og_logits[M,V] f32, masked per-token KL[M,1] f32)."""
    M, D = early2d.shape
    V = w_new.shape[1]
    tile_m = min(tile_m, M)
    tile_v = min(tile_v, V)
    assert M % tile_m == 0, (M, tile_m)
    assert V % tile_v == 0, (V, tile_v)
    grid = (M // tile_m, V // tile_v)

    out_shapes = (
        jax.ShapeDtypeStruct((M, V), jnp.float32),    # new_lm_head logits
        jax.ShapeDtypeStruct((M, V), jnp.float32),    # og_lm_head logits
        jax.ShapeDtypeStruct((M, 1), jnp.float32),    # masked per-token KL
    )
    in_specs = [
        pl.BlockSpec((tile_m, D), lambda i, j: (i, 0)),        # early activations
        pl.BlockSpec((tile_m, D), lambda i, j: (i, 0)),        # last hidden state
        pl.BlockSpec((1, D), lambda i, j: (0, 0)),             # gamma
        pl.BlockSpec((D, tile_v), lambda i, j: (0, j)),        # new head weight tile
        pl.BlockSpec((D, tile_v), lambda i, j: (0, j)),        # og head weight tile
        pl.BlockSpec((tile_m, 1), lambda i, j: (i, 0)),        # mask
    ]
    out_specs = [
        pl.BlockSpec((tile_m, tile_v), lambda i, j: (i, j)),
        pl.BlockSpec((tile_m, tile_v), lambda i, j: (i, j)),
        pl.BlockSpec((tile_m, 1), lambda i, j: (i, 0)),
    ]
    scratch = [
        pltpu.VMEM((tile_m, D), jnp.bfloat16),   # normed early acts (bf16)
        pltpu.VMEM((tile_m, D), jnp.bfloat16),   # last hidden (bf16)
        pltpu.VMEM((tile_m, 1), jnp.float32),    # m_og
        pltpu.VMEM((tile_m, 1), jnp.float32),    # s_og
        pltpu.VMEM((tile_m, 1), jnp.float32),    # t_og
        pltpu.VMEM((tile_m, 1), jnp.float32),    # m_new
        pltpu.VMEM((tile_m, 1), jnp.float32),    # s_new
    ]

    logits, og_logits, kl_tok = pl.pallas_call(
        _fused_heads_kl_kernel,
        out_shape=out_shapes,
        grid_spec=pltpu.PrefetchScalarGridSpec(
            num_scalar_prefetch=0,
            grid=grid,
            in_specs=in_specs,
            out_specs=out_specs,
            scratch_shapes=scratch,
        ),
        compiler_params=pltpu.CompilerParams(
            # M tiles are independent (megacore-shardable on v7x); the V axis
            # carries the scratch / online-reduction dependence -> arbitrary.
            dimension_semantics=("parallel", "arbitrary"),
            vmem_limit_bytes=VMEM_LIMIT_BYTES,
        ),
    )(early2d, last2d, gamma.reshape(1, D), w_new, w_og, mask2d)
    return logits, og_logits, kl_tok


# ----------------------------------------------------------------------------
# Synthetic "headless" Llama backbone (frozen pretrained model stand-in), plain JAX glue
# ----------------------------------------------------------------------------
def rmsnorm(x, g, eps=RMS_EPS):
    xf = x.astype(jnp.float32)
    var = jnp.mean(xf * xf, axis=-1, keepdims=True)
    return (xf * lax.rsqrt(var + eps)) * g


def rope_cos_sin(seq_len, head_dim, base=10000.0):
    inv_freq = 1.0 / (base ** (jnp.arange(0, head_dim, 2, dtype=jnp.float32) / head_dim))
    t = jnp.arange(seq_len, dtype=jnp.float32)
    freqs = jnp.outer(t, inv_freq)                           # (S, hd/2)
    emb = jnp.concatenate([freqs, freqs], axis=-1)           # (S, hd)
    return jnp.cos(emb), jnp.sin(emb)


def apply_rope(x, cos, sin):
    # x: (B, H, S, hd)
    hd = x.shape[-1]
    x1, x2 = x[..., : hd // 2], x[..., hd // 2:]
    rot = jnp.concatenate([-x2, x1], axis=-1)
    return x * cos[None, None] + rot * sin[None, None]


def decoder_layer(x, lp, n_heads, head_dim, cos, sin):
    B, S, D = x.shape
    # self-attention block
    h = rmsnorm(x, lp["ln1"])
    q = (h @ lp["wq"]).reshape(B, S, n_heads, head_dim).transpose(0, 2, 1, 3)
    k = (h @ lp["wk"]).reshape(B, S, n_heads, head_dim).transpose(0, 2, 1, 3)
    v = (h @ lp["wv"]).reshape(B, S, n_heads, head_dim).transpose(0, 2, 1, 3)
    q = apply_rope(q, cos, sin)
    k = apply_rope(k, cos, sin)
    scores = jnp.einsum("bhqd,bhkd->bhqk", q, k) / jnp.sqrt(jnp.float32(head_dim))
    causal = jnp.tril(jnp.ones((S, S), dtype=bool))
    scores = jnp.where(causal[None, None], scores, jnp.float32(-1e9))
    probs = jax.nn.softmax(scores, axis=-1)
    attn = jnp.einsum("bhqk,bhkd->bhqd", probs, v)
    attn = attn.transpose(0, 2, 1, 3).reshape(B, S, D)
    x = x + attn @ lp["wo"]
    # MLP block (SwiGLU)
    h = rmsnorm(x, lp["ln2"])
    mlp = (jax.nn.silu(h @ lp["wg"]) * (h @ lp["wu"])) @ lp["wd"]
    return x + mlp


def headless_forward(params, input_ids, n_heads, head_dim, early_exit_idx):
    """Returns (early_exit_activations, last_hidden_state[already final-normed])."""
    x = params["embed"][input_ids]                           # (B, S, D)
    S = input_ids.shape[1]
    cos, sin = rope_cos_sin(S, head_dim)
    early = None
    for i, lp in enumerate(params["layers"]):
        x = decoder_layer(x, lp, n_heads, head_dim, cos, sin)
        if i == early_exit_idx:
            early = x                                        # forward-hook equivalent
    last_hidden = rmsnorm(x, params["final_norm"])
    return early, last_hidden


# ----------------------------------------------------------------------------
# TruncatedLlama forward (loss_type='kl_divergence')
# ----------------------------------------------------------------------------
def truncated_llama_forward(params, input_ids, kl_loss_mask, n_heads, head_dim,
                            early_exit_idx, *, tile_m=128, tile_v=512):
    B, S = input_ids.shape
    D = params["embed"].shape[1]
    V = params["new_head"].shape[1]

    early, last_hidden = headless_forward(params, input_ids, n_heads, head_dim,
                                          early_exit_idx)

    early2d = early.reshape(B * S, D).astype(jnp.float32)
    last2d = last_hidden.reshape(B * S, D).astype(jnp.float32)
    mask2d = kl_loss_mask.astype(jnp.float32).reshape(B * S, 1)

    # Fused: RMSNorm(early) @ new_head, last_hidden @ og_head, masked KL stats,
    # all in one streaming pass over the vocab.
    logits2d, og2d, kl_tok = pallas_fused_heads_kl(
        early2d, last2d, params["final_norm"],
        params["new_head"], params["og_head"], mask2d,
        tile_m=tile_m, tile_v=tile_v)

    loss = jnp.sum(kl_tok) / jnp.float32(B)

    return {
        "loss": loss,
        "logits": logits2d.reshape(B, S, V),
        "og_lm_logits": og2d.reshape(B, S, V),
    }


# ----------------------------------------------------------------------------
# Pure-JAX reference (matches the kernel's bf16 matmul path for tight checks)
# ----------------------------------------------------------------------------
def reference_forward(params, input_ids, kl_loss_mask, n_heads, head_dim,
                      early_exit_idx):
    B, S = input_ids.shape
    early, last_hidden = headless_forward(params, input_ids, n_heads, head_dim,
                                          early_exit_idx)
    xe_n = rmsnorm(early, params["final_norm"]).astype(jnp.bfloat16)
    logits = jnp.dot(xe_n, params["new_head"], preferred_element_type=jnp.float32)
    xl = last_hidden.astype(jnp.bfloat16)
    og_logits = jnp.dot(xl, params["og_head"], preferred_element_type=jnp.float32)
    new_lp = jax.nn.log_softmax(logits, axis=-1)
    og_lp = jax.nn.log_softmax(og_logits, axis=-1)
    per_tok = jnp.sum(jnp.exp(og_lp) * (og_lp - new_lp), axis=-1)
    loss = jnp.sum(per_tok * kl_loss_mask.astype(jnp.float32)) / B
    return loss, logits, og_logits


# ----------------------------------------------------------------------------
# Deterministic parameter init
# ----------------------------------------------------------------------------
def init_params(key, vocab, hidden, n_layers, n_heads, head_dim, ffn):
    def nrm(k, shape, scale=0.02):
        return scale * jax.random.normal(k, shape, dtype=jnp.float32)

    keys = jax.random.split(key, 4 + n_layers)
    params = {
        "embed": nrm(keys[0], (vocab, hidden)),
        "final_norm": jnp.ones((hidden,), jnp.float32),
        # nn.Linear(in=hidden, out=vocab, bias=False), stored transposed [D, V],
        # in bf16 (halves the weight-streaming HBM traffic of the heads).
        "og_head": nrm(keys[1], (hidden, vocab)).astype(jnp.bfloat16),
        "new_head": nrm(keys[2], (hidden, vocab)).astype(jnp.bfloat16),  # lm_head_random_init=True
        "layers": [],
    }
    for i in range(n_layers):
        lk = jax.random.split(keys[4 + i], 7)
        params["layers"].append({
            "ln1": jnp.ones((hidden,), jnp.float32),
            "ln2": jnp.ones((hidden,), jnp.float32),
            "wq": nrm(lk[0], (hidden, n_heads * head_dim)),
            "wk": nrm(lk[1], (hidden, n_heads * head_dim)),
            "wv": nrm(lk[2], (hidden, n_heads * head_dim)),
            "wo": nrm(lk[3], (n_heads * head_dim, hidden)),
            "wg": nrm(lk[4], (hidden, ffn)),
            "wu": nrm(lk[5], (hidden, ffn)),
            "wd": nrm(lk[6], (ffn, hidden)),
        })
    return params


# ----------------------------------------------------------------------------
if __name__ == "__main__":
    B, S = 2, 8
    HIDDEN, VOCAB = 128, 512
    N_LAYERS, N_HEADS, HEAD_DIM, FFN = 3, 4, 32, 256
    EARLY_EXIT_IDX = 1

    root = jax.random.PRNGKey(0)
    k_params, k_ids, k_mask = jax.random.split(root, 3)

    params = init_params(k_params, VOCAB, HIDDEN, N_LAYERS, N_HEADS, HEAD_DIM, FFN)
    input_ids = jax.random.randint(k_ids, (B, S), 0, VOCAB, dtype=jnp.int32)
    kl_loss_mask = (jax.random.uniform(k_mask, (B, S)) > 0.25)   # bool mask

    # Small tiles here so the run exercises multiple M tiles (scratch reuse) and
    # multiple V tiles (online logsumexp/KL). Production defaults: tile_m=128,
    # tile_v=512.
    out = truncated_llama_forward(params, input_ids, kl_loss_mask,
                                  N_HEADS, HEAD_DIM, EARLY_EXIT_IDX,
                                  tile_m=8, tile_v=128)
    jax.block_until_ready(out)

    ref_loss, ref_logits, ref_og = reference_forward(
        params, input_ids, kl_loss_mask, N_HEADS, HEAD_DIM, EARLY_EXIT_IDX)
    jax.block_until_ready((ref_loss, ref_logits, ref_og))

    assert jnp.allclose(out["logits"], ref_logits, atol=1e-2, rtol=1e-2)
    assert jnp.allclose(out["og_lm_logits"], ref_og, atol=1e-2, rtol=1e-2)
    assert jnp.allclose(out["loss"], ref_loss, atol=1e-3, rtol=1e-3)

    print("KERNEL_OK")
</pallas_src>

<mosaic_0001>
module attributes {stable_mosaic.version = 11 : i64} {
  func.func @_fused_heads_kl_kernel(%arg0: i32, %arg1: i32, %arg2: memref<8x128xf32, #tpu.memory_space<vmem>>, %arg3: memref<8x128xf32, #tpu.memory_space<vmem>>, %arg4: memref<1x128xf32, #tpu.memory_space<vmem>>, %arg5: memref<128x128xbf16, #tpu.memory_space<vmem>>, %arg6: memref<128x128xbf16, #tpu.memory_space<vmem>>, %arg7: memref<8x1xf32, #tpu.memory_space<vmem>>, %arg8: memref<8x128xf32, #tpu.memory_space<vmem>>, %arg9: memref<8x128xf32, #tpu.memory_space<vmem>>, %arg10: memref<8x1xf32, #tpu.memory_space<vmem>>, %arg11: memref<8x128xbf16, #tpu.memory_space<vmem>>, %arg12: memref<8x128xbf16, #tpu.memory_space<vmem>>, %arg13: memref<8x1xf32, #tpu.memory_space<vmem>>, %arg14: memref<8x1xf32, #tpu.memory_space<vmem>>, %arg15: memref<8x1xf32, #tpu.memory_space<vmem>>, %arg16: memref<8x1xf32, #tpu.memory_space<vmem>>, %arg17: memref<8x1xf32, #tpu.memory_space<vmem>>) attributes {dimension_semantics = [#tpu.dimension_semantics<parallel>, #tpu.dimension_semantics<arbitrary>], iteration_bounds = array<i64: 2, 4>, scalar_prefetch = 0 : i64, scratch_operands = 7 : i64, tpu.core_type = #tpu.core_type<tc>, window_params = [{transform_indices = @transform_0, window_bounds = array<i64: 8, 128>}, {transform_indices = @transform_1, window_bounds = array<i64: 8, 128>}, {pipeline_mode = #tpu.pipeline_mode<synchronous>, transform_indices = @transform_2, window_bounds = array<i64: 1, 128>}, {transform_indices = @transform_3, window_bounds = array<i64: 128, 128>}, {transform_indices = @transform_4, window_bounds = array<i64: 128, 128>}, {transform_indices = @transform_5, window_bounds = array<i64: 8, 1>}, {transform_indices = @transform_6, window_bounds = array<i64: 8, 128>}, {transform_indices = @transform_7, window_bounds = array<i64: 8, 128>}, {transform_indices = @transform_8, window_bounds = array<i64: 8, 1>}]} {
    %c0_i32 = arith.constant 0 : i32
    %0 = arith.cmpi eq, %arg1, %c0_i32 : i32
    %1 = arith.extui %0 : i1 to i32
    %c0_i32_0 = arith.constant 0 : i32
    %2 = arith.cmpi ne, %1, %c0_i32_0 : i32
    scf.if %2 {
      %c0_43 = arith.constant 0 : index
      %c0_44 = arith.constant 0 : index
      %56 = vector.load %arg2[%c0_43, %c0_44] : memref<8x128xf32, #tpu.memory_space<vmem>>, vector<8x128xf32>
      %57 = arith.mulf %56, %56 : vector<8x128xf32>
      %cst_45 = arith.constant dense<0.000000e+00> : vector<8xf32>
      %58 = vector.multi_reduction <add>, %57, %cst_45 [1] : vector<8x128xf32> to vector<8xf32>
      %59 = vector.shape_cast %58 : vector<8xf32> to vector<8x1xf32>
      %cst_46 = arith.constant 1.280000e+02 : f32
      %60 = vector.broadcast %cst_46 : f32 to vector<8x1xf32>
      %61 = arith.divf %59, %60 : vector<8x1xf32>
      %cst_47 = arith.constant 9.99999974E-6 : f32
      %62 = vector.broadcast %cst_47 : f32 to vector<8x1xf32>
      %63 = arith.addf %61, %62 : vector<8x1xf32>
      %64 = math.rsqrt %63 : vector<8x1xf32>
      %65 = vector.broadcast %64 : vector<8x1xf32> to vector<8x128xf32>
      %66 = arith.mulf %56, %65 : vector<8x128xf32>
      %c0_48 = arith.constant 0 : index
      %c0_49 = arith.constant 0 : index
      %67 = vector.load %arg4[%c0_48, %c0_49] : memref<1x128xf32, #tpu.memory_space<vmem>>, vector<1x128xf32>
      %68 = vector.broadcast %67 : vector<1x128xf32> to vector<8x128xf32>
      %69 = arith.mulf %66, %68 : vector<8x128xf32>
      %70 = arith.truncf %69 : vector<8x128xf32> to vector<8x128xbf16>
      %c0_50 = arith.constant 0 : index
      %c0_51 = arith.constant 0 : index
      %71 = vector.load %arg11[%c0_50, %c0_51] : memref<8x128xbf16, #tpu.memory_space<vmem>>, vector<8x128xbf16>
      tpu.vector_store %arg11[%c0_50, %c0_51], %70 {strides = array<i32>} : memref<8x128xbf16, #tpu.memory_space<vmem>>, vector<8x128xbf16>,
      %c0_52 = arith.constant 0 : index
      %c0_53 = arith.constant 0 : index
      %72 = vector.load %arg3[%c0_52, %c0_53] : memref<8x128xf32, #tpu.memory_space<vmem>>, vector<8x128xf32>
      %73 = arith.truncf %72 : vector<8x128xf32> to vector<8x128xbf16>
      %c0_54 = arith.constant 0 : index
      %c0_55 = arith.constant 0 : index
      %74 = vector.load %arg12[%c0_54, %c0_55] : memref<8x128xbf16, #tpu.memory_space<vmem>>, vector<8x128xbf16>
      tpu.vector_store %arg12[%c0_54, %c0_55], %73 {strides = array<i32>} : memref<8x128xbf16, #tpu.memory_space<vmem>>, vector<8x128xbf16>,
      %cst_56 = arith.constant 0xFF800000 : f32
      %75 = vector.broadcast %cst_56 : f32 to vector<8x1xf32>
      %c0_57 = arith.constant 0 : index
      %c0_58 = arith.constant 0 : index
      %76 = vector.load %arg13[%c0_57, %c0_58] : memref<8x1xf32, #tpu.memory_space<vmem>>, vector<8x1xf32>
      tpu.vector_store %arg13[%c0_57, %c0_58], %75 {strides = array<i32>} : memref<8x1xf32, #tpu.memory_space<vmem>>, vector<8x1xf32>,
      %cst_59 = arith.constant 0.000000e+00 : f32
      %77 = vector.broadcast %cst_59 : f32 to vector<8x1xf32>
      %c0_60 = arith.constant 0 : index
      %c0_61 = arith.constant 0 : index
      %78 = vector.load %arg14[%c0_60, %c0_61] : memref<8x1xf32, #tpu.memory_space<vmem>>, vector<8x1xf32>
      tpu.vector_store %arg14[%c0_60, %c0_61], %77 {strides = array<i32>} : memref<8x1xf32, #tpu.memory_space<vmem>>, vector<8x1xf32>,
      %cst_62 = arith.constant 0.000000e+00 : f32
      %79 = vector.broadcast %cst_62 : f32 to vector<8x1xf32>
      %c0_63 = arith.constant 0 : index
      %c0_64 = arith.constant 0 : index
      %80 = vector.load %arg15[%c0_63, %c0_64] : memref<8x1xf32, #tpu.memory_space<vmem>>, vector<8x1xf32>
      tpu.vector_store %arg15[%c0_63, %c0_64], %79 {strides = array<i32>} : memref<8x1xf32, #tpu.memory_space<vmem>>, vector<8x1xf32>,
      %cst_65 = arith.constant 0xFF800000 : f32
      %81 = vector.broadcast %cst_65 : f32 to vector<8x1xf32>
      %c0_66 = arith.constant 0 : index
      %c0_67 = arith.constant 0 : index
      %82 = vector.load %arg16[%c0_66, %c0_67] : memref<8x1xf32, #tpu.memory_space<vmem>>, vector<8x1xf32>
      tpu.vector_store %arg16[%c0_66, %c0_67], %81 {strides = array<i32>} : memref<8x1xf32, #tpu.memory_space<vmem>>, vector<8x1xf32>,
      %cst_68 = arith.constant 0.000000e+00 : f32
      %83 = vector.broadcast %cst_68 : f32 to vector<8x1xf32>
      %c0_69 = arith.constant 0 : index
      %c0_70 = arith.constant 0 : index
      %84 = vector.load %arg17[%c0_69, %c0_70] : memref<8x1xf32, #tpu.memory_space<vmem>>, vector<8x1xf32>
      tpu.vector_store %arg17[%c0_69, %c0_70], %83 {strides = array<i32>} : memref<8x1xf32, #tpu.memory_space<vmem>>, vector<8x1xf32>,
    } else {
    }
    %c0 = arith.constant 0 : index
    %c0_1 = arith.constant 0 : index
    %3 = vector.load %arg11[%c0, %c0_1] : memref<8x128xbf16, #tpu.memory_space<vmem>>, vector<8x128xbf16>
    %c0_2 = arith.constant 0 : index
    %c0_3 = arith.constant 0 : index
    %4 = vector.load %arg5[%c0_2, %c0_3] : memref<128x128xbf16, #tpu.memory_space<vmem>>, vector<128x128xbf16>
    %cst = arith.constant dense<0.000000e+00> : vector<8x128xf32>
    %5 = tpu.matmul %3, %4, %cst {dimension_numbers = #tpu.dot_dimension_numbers<[1], [0], [0], [1], [0, 0, 1, 1], [], []>} : vector<8x128xbf16>, vector<128x128xbf16>, vector<8x128xf32> -> vector<8x128xf32>
    %c0_4 = arith.constant 0 : index
    %c0_5 = arith.constant 0 : index
    %6 = vector.load %arg12[%c0_4, %c0_5] : memref<8x128xbf16, #tpu.memory_space<vmem>>, vector<8x128xbf16>
    %c0_6 = arith.constant 0 : index
    %c0_7 = arith.constant 0 : index
    %7 = vector.load %arg6[%c0_6, %c0_7] : memref<128x128xbf16, #tpu.memory_space<vmem>>, vector<128x128xbf16>
    %cst_8 = arith.constant dense<0.000000e+00> : vector<8x128xf32>
    %8 = tpu.matmul %6, %7, %cst_8 {dimension_numbers = #tpu.dot_dimension_numbers<[1], [0], [0], [1], [0, 0, 1, 1], [], []>} : vector<8x128xbf16>, vector<128x128xbf16>, vector<8x128xf32> -> vector<8x128xf32>
    %c0_9 = arith.constant 0 : index
    %c0_10 = arith.constant 0 : index
    %9 = vector.load %arg8[%c0_9, %c0_10] : memref<8x128xf32, #tpu.memory_space<vmem>>, vector<8x128xf32>
    tpu.vector_store %arg8[%c0_9, %c0_10], %5 {strides = array<i32>} : memref<8x128xf32, #tpu.memory_space<vmem>>, vector<8x128xf32>,
    %c0_11 = arith.constant 0 : index
    %c0_12 = arith.constant 0 : index
    %10 = vector.load %arg9[%c0_11, %c0_12] : memref<8x128xf32, #tpu.memory_space<vmem>>, vector<8x128xf32>
    tpu.vector_store %arg9[%c0_11, %c0_12], %8 {strides = array<i32>} : memref<8x128xf32, #tpu.memory_space<vmem>>, vector<8x128xf32>,
    %c0_13 = arith.constant 0 : index
    %c0_14 = arith.constant 0 : index
    %11 = vector.load %arg13[%c0_13, %c0_14] : memref<8x1xf32, #tpu.memory_space<vmem>>, vector<8x1xf32>
    %cst_15 = arith.constant dense<0xFF800000> : vector<8xf32>
    %12 = vector.multi_reduction <maximumf>, %8, %cst_15 [1] : vector<8x128xf32> to vector<8xf32>
    %13 = vector.shape_cast %12 : vector<8xf32> to vector<8x1xf32>
    %14 = arith.maximumf %11, %13 : vector<8x1xf32>
    %c0_16 = arith.constant 0 : index
    %c0_17 = arith.constant 0 : index
    %15 = vector.load %arg13[%c0_16, %c0_17] : memref<8x1xf32, #tpu.memory_space<vmem>>, vector<8x1xf32>
    %16 = arith.subf %15, %14 : vector<8x1xf32>
    %17 = math.exp %16 : vector<8x1xf32>
    %18 = vector.broadcast %14 : vector<8x1xf32> to vector<8x128xf32>
    %19 = arith.subf %8, %18 : vector<8x128xf32>
    %20 = math.exp %19 : vector<8x128xf32>
    %c0_18 = arith.constant 0 : index
    %c0_19 = arith.constant 0 : index
    %21 = vector.load %arg14[%c0_18, %c0_19] : memref<8x1xf32, #tpu.memory_space<vmem>>, vector<8x1xf32>
    %22 = arith.mulf %17, %21 : vector<8x1xf32>
    %cst_20 = arith.constant dense<0.000000e+00> : vector<8xf32>
    %23 = vector.multi_reduction <add>, %20, %cst_20 [1] : vector<8x128xf32> to vector<8xf32>
    %24 = vector.shape_cast %23 : vector<8xf32> to vector<8x1xf32>
    %25 = arith.addf %22, %24 : vector<8x1xf32>
    %c0_21 = arith.constant 0 : index
    %c0_22 = arith.constant 0 : index
    %26 = vector.load %arg14[%c0_21, %c0_22] : memref<8x1xf32, #tpu.memory_space<vmem>>, vector<8x1xf32>
    tpu.vector_store %arg14[%c0_21, %c0_22], %25 {strides = array<i32>} : memref<8x1xf32, #tpu.memory_space<vmem>>, vector<8x1xf32>,
    %c0_23 = arith.constant 0 : index
    %c0_24 = arith.constant 0 : index
    %27 = vector.load %arg15[%c0_23, %c0_24] : memref<8x1xf32, #tpu.memory_space<vmem>>, vector<8x1xf32>
    %28 = arith.mulf %17, %27 : vector<8x1xf32>
    %29 = arith.subf %8, %5 : vector<8x128xf32>
    %30 = arith.mulf %20, %29 : vector<8x128xf32>
    %cst_25 = arith.constant dense<0.000000e+00> : vector<8xf32>
    %31 = vector.multi_reduction <add>, %30, %cst_25 [1] : vector<8x128xf32> to vector<8xf32>
    %32 = vector.shape_cast %31 : vector<8xf32> to vector<8x1xf32>
    %33 = arith.addf %28, %32 : vector<8x1xf32>
    %c0_26 = arith.constant 0 : index
    %c0_27 = arith.constant 0 : index
    %34 = vector.load %arg15[%c0_26, %c0_27] : memref<8x1xf32, #tpu.memory_space<vmem>>, vector<8x1xf32>
    tpu.vector_store %arg15[%c0_26, %c0_27], %33 {strides = array<i32>} : memref<8x1xf32, #tpu.memory_space<vmem>>, vector<8x1xf32>,
    %c0_28 = arith.constant 0 : index
    %c0_29 = arith.constant 0 : index
    %35 = vector.load %arg13[%c0_28, %c0_29] : memref<8x1xf32, #tpu.memory_space<vmem>>, vector<8x1xf32>
    tpu.vector_store %arg13[%c0_28, %c0_29], %14 {strides = array<i32>} : memref<8x1xf32, #tpu.memory_space<vmem>>, vector<8x1xf32>,
    %c0_30 = arith.constant 0 : index
    %c0_31 = arith.constant 0 : index
    %36 = vector.load %arg16[%c0_30, %c0_31] : memref<8x1xf32, #tpu.memory_space<vmem>>, vector<8x1xf32>
    %cst_32 = arith.constant dense<0xFF800000> : vector<8xf32>
    %37 = vector.multi_reduction <maximumf>, %5, %cst_32 [1] : vector<8x128xf32> to vector<8xf32>
    %38 = vector.shape_cast %37 : vector<8xf32> to vector<8x1xf32>
    %39 = arith.maximumf %36, %38 : vector<8x1xf32>
    %c0_33 = arith.constant 0 : index
    %c0_34 = arith.constant 0 : index
    %40 = vector.load %arg16[%c0_33, %c0_34] : memref<8x1xf32, #tpu.memory_space<vmem>>, vector<8x1xf32>
    %41 = arith.subf %40, %39 : vector<8x1xf32>
    %42 = math.exp %41 : vector<8x1xf32>
    %c0_35 = arith.constant 0 : index
    %c0_36 = arith.constant 0 : index
    %43 = vector.load %arg17[%c0_35, %c0_36] : memref<8x1xf32, #tpu.memory_space<vmem>>, vector<8x1xf32>
    %44 = arith.mulf %42, %43 : vector<8x1xf32>
    %45 = vector.broadcast %39 : vector<8x1xf32> to vector<8x128xf32>
    %46 = arith.subf %5, %45 : vector<8x128xf32>
    %47 = math.exp %46 : vector<8x128xf32>
    %cst_37 = arith.constant dense<0.000000e+00> : vector<8xf32>
    %48 = vector.multi_reduction <add>, %47, %cst_37 [1] : vector<8x128xf32> to vector<8xf32>
    %49 = vector.shape_cast %48 : vector<8xf32> to vector<8x1xf32>
    %50 = arith.addf %44, %49 : vector<8x1xf32>
    %c0_38 = arith.constant 0 : index
    %c0_39 = arith.constant 0 : index
    %51 = vector.load %arg17[%c0_38, %c0_39] : memref<8x1xf32, #tpu.memory_space<vmem>>, vector<8x1xf32>
    tpu.vector_store %arg17[%c0_38, %c0_39], %50 {strides = array<i32>} : memref<8x1xf32, #tpu.memory_space<vmem>>, vector<8x1xf32>,
    %c0_40 = arith.constant 0 : index
    %c0_41 = arith.constant 0 : index
    %52 = vector.load %arg16[%c0_40, %c0_41] : memref<8x1xf32, #tpu.memory_space<vmem>>, vector<8x1xf32>
    tpu.vector_store %arg16[%c0_40, %c0_41], %39 {strides = array<i32>} : memref<8x1xf32, #tpu.memory_space<vmem>>, vector<8x1xf32>,
    %c3_i32 = arith.constant 3 : i32
    %53 = arith.cmpi eq, %arg1, %c3_i32 : i32
    %54 = arith.extui %53 : i1 to i32
    %c0_i32_42 = arith.constant 0 : i32
    %55 = arith.cmpi ne, %54, %c0_i32_42 : i32
    scf.if %55 {
      %c0_43 = arith.constant 0 : index
      %c0_44 = arith.constant 0 : index
      %56 = vector.load %arg13[%c0_43, %c0_44] : memref<8x1xf32, #tpu.memory_space<vmem>>, vector<8x1xf32>
      %c0_45 = arith.constant 0 : index
      %c0_46 = arith.constant 0 : index
      %57 = vector.load %arg14[%c0_45, %c0_46] : memref<8x1xf32, #tpu.memory_space<vmem>>, vector<8x1xf32>
      %58 = math.log %57 : vector<8x1xf32>
      %59 = arith.addf %56, %58 : vector<8x1xf32>
      %c0_47 = arith.constant 0 : index
      %c0_48 = arith.constant 0 : index
      %60 = vector.load %arg16[%c0_47, %c0_48] : memref<8x1xf32, #tpu.memory_space<vmem>>, vector<8x1xf32>
      %c0_49 = arith.constant 0 : index
      %c0_50 = arith.constant 0 : index
      %61 = vector.load %arg17[%c0_49, %c0_50] : memref<8x1xf32, #tpu.memory_space<vmem>>, vector<8x1xf32>
      %62 = math.log %61 : vector<8x1xf32>
      %63 = arith.addf %60, %62 : vector<8x1xf32>
      %c0_51 = arith.constant 0 : index
      %c0_52 = arith.constant 0 : index
      %64 = vector.load %arg15[%c0_51, %c0_52] : memref<8x1xf32, #tpu.memory_space<vmem>>, vector<8x1xf32>
      %c0_53 = arith.constant 0 : index
      %c0_54 = arith.constant 0 : index
      %65 = vector.load %arg14[%c0_53, %c0_54] : memref<8x1xf32, #tpu.memory_space<vmem>>, vector<8x1xf32>
      %66 = arith.divf %64, %65 : vector<8x1xf32>
      %67 = arith.subf %66, %59 : vector<8x1xf32>
      %68 = arith.addf %67, %63 : vector<8x1xf32>
      %c0_55 = arith.constant 0 : index
      %c0_56 = arith.constant 0 : index
      %69 = vector.load %arg7[%c0_55, %c0_56] : memref<8x1xf32, #tpu.memory_space<vmem>>, vector<8x1xf32>
      %70 = arith.mulf %68, %69 : vector<8x1xf32>
      %c0_57 = arith.constant 0 : index
      %c0_58 = arith.constant 0 : index
      %71 = vector.load %arg10[%c0_57, %c0_58] : memref<8x1xf32, #tpu.memory_space<vmem>>, vector<8x1xf32>
      tpu.vector_store %arg10[%c0_57, %c0_58], %70 {strides = array<i32>} : memref<8x1xf32, #tpu.memory_space<vmem>>, vector<8x1xf32>,
    } else {
    }
    return
  }
  func.func @transform_0(%arg0: i32, %arg1: i32) -> (i32, i32) {
    %c0_i32 = arith.constant 0 : i32
    %c0_i32_0 = arith.constant 0 : i32
    return %arg0, %c0_i32 : i32, i32
  }
  func.func @transform_1(%arg0: i32, %arg1: i32) -> (i32, i32) {
    %c0_i32 = arith.constant 0 : i32
    %c0_i32_0 = arith.constant 0 : i32
    return %arg0, %c0_i32 : i32, i32
  }
  func.func @transform_2(%arg0: i32, %arg1: i32) -> (i32, i32) {
    %c0_i32 = arith.constant 0 : i32
    %c0_i32_0 = arith.constant 0 : i32
    %c0_i32_1 = arith.constant 0 : i32
    return %c0_i32, %c0_i32_0 : i32, i32
  }
  func.func @transform_3(%arg0: i32, %arg1: i32) -> (i32, i32) {
    %c0_i32 = arith.constant 0 : i32
    %c0_i32_0 = arith.constant 0 : i32
    return %c0_i32, %arg1 : i32, i32
  }
  func.func @transform_4(%arg0: i32, %arg1: i32) -> (i32, i32) {
    %c0_i32 = arith.constant 0 : i32
    %c0_i32_0 = arith.constant 0 : i32
    return %c0_i32, %arg1 : i32, i32
  }
  func.func @transform_5(%arg0: i32, %arg1: i32) -> (i32, i32) {
    %c0_i32 = arith.constant 0 : i32
    %c0_i32_0 = arith.constant 0 : i32
    return %arg0, %c0_i32 : i32, i32
  }
  func.func @transform_6(%arg0: i32, %arg1: i32) -> (i32, i32) {
    %c0_i32 = arith.constant 0 : i32
    return %arg0, %arg1 : i32, i32
  }
  func.func @transform_7(%arg0: i32, %arg1: i32) -> (i32, i32) {
    %c0_i32 = arith.constant 0 : i32
    return %arg0, %arg1 : i32, i32
  }
  func.func @transform_8(%arg0: i32, %arg1: i32) -> (i32, i32) {
    %c0_i32 = arith.constant 0 : i32
    %c0_i32_0 = arith.constant 0 : i32
    return %arg0, %c0_i32 : i32, i32
  }
}

</mosaic_0001>

<bundles_post_ra>
// kernel: tpu_custom_call.1
= control target key start
LH: loop header
LB: loop body
LE: loop exit
PB: predicated region body
PF: predicated region fallthrough
CT: control target
= control target key end

     0   :  { %s2124_s0 = inlined_call_operand.vmem [shape: f32[16,128], index: 0, kind: input, shape index: {}]   ;;  %s2125_s1 = inlined_call_operand.hbm [shape: f32[16,128], index: 1, kind: input, shape index: {}]   ;;  %s2126_s2 = inlined_call_operand.vmem [shape: f32[1,128], index: 2, kind: input, shape index: {}]   ;;  %s2127_s3 = inlined_call_operand.hbm [shape: bf16[128,512], index: 3, kind: input, shape index: {}]   ;;  %s2128_s4 = inlined_call_operand.hbm [shape: bf16[128,512], index: 4, kind: input, shape index: {}]   ;;  %s2129_s5 = inlined_call_operand.vmem [shape: f32[16,1], index: 5, kind: input, shape index: {}]   ;;  %s2130_s6 = inlined_call_operand.hbm [shape: f32[16,512], index: 6, kind: output, shape index: {0}]   ;;  %s2131_s7 = inlined_call_operand.hbm [shape: f32[16,512], index: 7, kind: output, shape index: {1}]   ;;  %s2132_s8 = inlined_call_operand.vmem [shape: f32[16,1], index: 8, kind: output, shape index: {2}]  }
   0x1   :  { %2151 = sst [smem:[#allocation32_spill]] %s2124_s0 }
   0x2   :  { %2152 = sst [smem:[#allocation33_spill]] %s2125_s1 }
   0x3   :  { %2153 = sst [smem:[#allocation34_spill]] %s2126_s2 }
   0x4   :  { %2154 = sst [smem:[#allocation35_spill]] %s2127_s3 }
   0x5   :  { %2155 = sst [smem:[#allocation36_spill]] %s2128_s4 }
   0x6   :  { %2156 = sst [smem:[#allocation37_spill]] %s2129_s5 }
   0x7   :  { %2157 = sst [smem:[#allocation38_spill]] %s2130_s6 }
   0x8   :  { %2158 = sst [smem:[#allocation39_spill]] %s2131_s7 }
   0x9   :  { %2159 = sst [smem:[#allocation40_spill]] %s2132_s8 }
   0xa   :  { %14 = vsyncpa [#allocation10], 0 }
   0xb   :  { %16 = vsyncpa [#allocation10 + $0x1], 0 }
   0xc   :  { %17 = vsyncpa [#allocation13], 0 }
   0xd   :  { %19 = vsyncpa [#allocation13 + $0x1], 0 }
   0xe   :  { %20 = vsyncpa [#allocation11], 0 }
   0xf   :  { %22 = vsyncpa [#allocation11 + $0x1], 0 }
  0x10   :  { %23 = vsyncpa [#allocation17], 0 }
  0x11   :  { %25 = vsyncpa [#allocation17 + $0x1], 0  ;;  %s1657_s27 = smov 0   ;;  %s1659_s28 = smov 0  }
  0x12   :  { %s1661_s29 = smov 0   ;;  %s1663_s30 = smov 0  }
  0x13   :  { %s1665_s9 = smov 0   ;;  %s1667_s10 = smov 0  }
  0x14   :  { %s1669_s11 = smov 0   ;;  %s1671_s12 = smov 0  }
  0x15   :  { %s1673_s13 = smov 0   ;;  %s1675_s14 = smov 0  }
  0x16   :  { %s1677_s15 = smov 0   ;;  %s1679_s16 = smov 0  }
  0x17   :  { %s1681_s17 = smov 0   ;;  %s1683_s18 = smov 0  }
  0x18 LB: > { %2160 = sst [smem:[#allocation22_spill]] %s1565_s10  ;;  %p84_p0 = scmp.eq.s32.totalorder %s1597_s18, 0  ;;  %s1597_s18 = sphi %s1683_s18, %s31_s18   ;;  %s1593_s17 = sphi %s1681_s17, %s2216_s17   ;;  %s1589_s16 = sphi %s1679_s16, %s2215_s16   ;;  %s1585_s15 = sphi %s1677_s15, %s2225_s15   ;;  %s1581_s14 = sphi %s1675_s14, %s2213_s14   ;;  %s1577_s13 = sphi %s1673_s13, %s2212_s13   ;;  %s1573_s12 = sphi %s1671_s12, %s2224_s12   ;;  %s1569_s11 = sphi %s1669_s11, %s2223_s11   ;;  %s1565_s10 = sphi %s1667_s10, %s2210_s10   ;;  %s1561_s9 = sphi %s1665_s9, %s2222_s9   ;;  %s1557_s30 = sphi %s1663_s30, %s2221_s30   ;;  %s1553_s29 = sphi %s1661_s29, %s2220_s29   ;;  %s1549_s28 = sphi %s1659_s28, %s2219_s28   ;;  %s1545_s27 = sphi %s1657_s27, %s2218_s27  }
  0x19   : > { %2161 = sst [smem:[#allocation23_spill]] %s1577_s13  ;;  %p130_p1 = scmp.ne.s32.totalorder %s1565_s10, %s1561_s9 }
  0x1a   : > { %2162 = sst [smem:[#allocation24_spill]] %s1581_s14  ;;  %p2136_p2 = scmp.lt.s32.totalorder %s1597_s18, 8 }
  0x1b   : > { %2163 = sst [smem:[#allocation25_spill]] %s1585_s15  ;;  %p132_p3 = por %p130_p1, %p84_p0 }
  0x1c   : > { %2164 = sst [smem:[#allocation26_spill]] %s1589_s16  ;;  %s322_s19 = sand.u32 1, %s1597_s18  }
  0x1d   : > { %2165 = sst [smem:[#allocation27_spill]] %s1593_s17  ;;  %s324_s20 = sand.u32 1, %s1565_s10  }
  0x1e   : > { %s1735_s21 = sshll.u32 %s324_s20, 6  ;;  %s2135_s22 = sshll.u32 %s1589_s16, 6 }
  0x1f   : > { %s2166_s3 = sld [smem:[#allocation35_spill]]  ;;  %s326_s26 = scalar_lea.vmem [#allocation12], %s1735_s21 }
  0x20   : > { %s332_s7 = sshll.u32 %s326_s26, 4  ;;  %p1748_p4 = pnand %p2136_p2, %p132_p3  ;;  %s1752_s7 = int_to_ptr.vmem [resolvable:$true] %s332_s7 }
  0x21   : > { %s1754_s20 = scalar_lea.sflag [#allocation13], %s322_s19 }
  0x22   : > { %p2142_p6 = pneg %p1748_p4 }
  0x25   : > { %s1743_s25 = scalar_lea.hbm %s2166_s3, %s2135_s22  ;;  %s1330_s22 = scalar_lea.hbm %s2166_s3, 4096 }
  0x26   : > { %s1325_s23 = scalar_lea.hbm %s1743_s25, 1024  ;;  %p1331_p9 = scmp.lt.u32.totalorder %s1743_s25, %s2166_s3 }
  0x27   : > { %p1326_p5 = scmp.ne.s32.totalorder %s1743_s25, %s1325_s23  ;;  %p1332_p10 = scmp.lt.u32.totalorder %s1330_s22, %s1325_s23 }
  0x28   : > { %p1334_p12 = scmp.lt.u32.totalorder %s1325_s23, %s1743_s25 }
  0x29   : > { %p1328_p7 = pnand %p2142_p6, %p1326_p5  ;;  %p1333_p11 = por %p1332_p10, %p1331_p9 }
  0x2b   : > { %p1329_p8 = pneg %p1328_p7  ;;  %p1335_p13 = por %p1334_p12, %p1333_p11 }
  0x2d   : > { %p1336_p1 = pnand %p1335_p13, %p1329_p8 }
  0x2f   : > { %1339 = shalt.err (!%p1336_p1)
}
  0x30   : > { %s1340_s19 = scalar_lea.vmem %s1752_s7, 1024  ;;  %s1599_s24 = smov [#allocation12]  }
  0x31   : > { %p1341_p3 = scmp.ne.s32.totalorder %s1752_s7, %s1340_s19  ;;  %s1345_s26 = sshll.u32 %s1599_s24, 4  ;;  %s1346_s26 = int_to_ptr.vmem [resolvable:$false] %s1345_s26 }
  0x32   : > { %s1347_s2 = scalar_lea.vmem %s1346_s26, 2048  ;;  %p1348_p2 = scmp.lt.s32.totalorder %s1752_s7, %s1346_s26 }
  0x33   : > { %p1343_p5 = pnand %p1341_p3, %p2142_p6  ;;  %p1349_p9 = scmp.lt.s32.totalorder %s1347_s2, %s1340_s19 }
  0x35   : > { %p1344_p7 = pneg %p1343_p5  ;;  %p1350_p10 = por %p1349_p9, %p1348_p2 }
  0x37   : > { %p1351_p11 = pnand %p1350_p10, %p1344_p7 }
  0x39   : > { %1354 = shalt.err (!%p1351_p11)
}
  0x3a   : > { %s2137_s14 = smov 256   ;;  %s2138_s22 = smov 64  }
  0x3b   : > { %s2139_s23 = smov 4   ;;  %s2168_s19 = sshll.u32 %s1589_s16, 6 }
  0x3c   : > { %1158 = dma.hbm_to_vmem [thread:$0]  (!%p1748_p4), %s1743_s25, 1024, %s1752_s7, %s1754_s20, %s2137_s14, %s2138_s22, %s2139_s23  }
  0x3d   : > { %s2169_s4 = sld [smem:[#allocation36_spill]]  ;;  %s346_s3 = scalar_lea.vmem [#allocation14], %s1735_s21 }
  0x3e   : > { %s1793_s8 = sshll.u32 %s346_s3, 4  ;;  %p1048_p2 = scmp.ge.s32.totalorder %s1597_s18, 1  ;;  %s1880_s8 = int_to_ptr.vmem [resolvable:$true] %s1793_s8 }
  0x3f   : > { %p367_p8 = scmp.lt.s32.totalorder %s1597_s18, 9  ;;  %s1802_s0 = sadd.s32 4294967295, %s1597_s18  }
  0x40   : > { %s40_s25 = sadd.s32 1, %s1589_s16  ;;  %s76_s3 = sadd.s32 1, %s1577_s13 }
  0x41   : > { %p1797_p12 = pnand %p1048_p2, %p367_p8  ;;  %p41_p13 = scmp.ge.s32.totalorder %s40_s25, 4 }
  0x42   : > { %p83_p1 = scmp.ne.s32.totalorder %s1577_s13, %s1573_s12  ;;  %p89_p3 = scmp.ne.s32.totalorder %s1573_s12, %s1569_s11 }
  0x43   : > { %s1790_s2 = scalar_lea.hbm %s2169_s4, %s2168_s19  ;;  %s43_s19 = sadd.s32 1, %s1593_s17 }
  0x44   : > { %s2170_s5 = scalar_select %p1797_p12, 1, 0 }
  0x45   : > { %s2227_s25 = smov (%p41_p13, %s40_s25), 0  ;;  %s2229_s19 = smov (!%p41_p13, %s43_s19), %s1593_s17 }
  0x46   : > { %2171 = sst [smem:[#allocation28_spill]] %s2227_s25  ;;  %p1817_p5 = por %p84_p0, %p83_p1 }
  0x47   : > { %p90_p7 = scmp.eq.s32.totalorder %s1802_s0, 0  ;;  %p45_p9 = scmp.ge.s32.totalorder %s2229_s19, 2 }
  0x48   : > { %s120_s24 = ssub.s32 %s1589_s16, %s2227_s25  ;;  %s123_s26 = sadd.s32 1, %s1565_s10 }
  0x49   : > { %p1824_p10 = por %p90_p7, %p89_p3  ;;  %p121_p11 = scmp.eq.s32.totalorder %s120_s24, 0 }
  0x4a   : > { %s2231_s19 = smov (%p45_p9, %s2229_s19), 0  ;;  %p136_p0 = scmp.ne.s32.totalorder %s1561_s9, %s1557_s30 }
  0x4b   : > { %s2173_s11 = scalar_select %p1824_p10, 1, 0 }
  0x4c   : > { %2174 = sst [smem:[#allocation29_spill]] %s2231_s19  ;;  %s73_s14 = ssub.s32 %s1593_s17, %s2231_s19 }
  0x4d   : > { %s203_s22 = sadd.s32 1, %s1553_s29  ;;  %p74_p2 = scmp.eq.s32.totalorder %s73_s14, 0 }
  0x4e   : > { %p1836_p8 = por %p136_p0, %p90_p7  ;;  %s200_s16 = sor.u32 %s120_s24, %s73_s14 }
  0x4f   : > { %s1841_s7 = scalar_select %p121_p11, %s1565_s10, %s123_s26  }
  0x50   : > { %s2175_s23 = scalar_select %p1836_p8, 1, 0 }
  0x51   : > { %2176 = sst [smem:[#allocation30_spill]] %s1841_s7  ;;  %p213_p13 = scmp.ne.s32.totalorder %s1553_s29, %s1549_s28 }
  0x52   : > { %s1844_s25 = scalar_select %p74_p2, %s1577_s13, %s76_s3  }
  0x53   : > { %p201_p1 = scmp.eq.s32.totalorder %s200_s16, 0  ;;  %p214_p3 = scmp.eq.s32.totalorder %s1802_s0, 7 }
  0x54   : > { %2177 = sst [smem:[#allocation31_spill]] %s1844_s25  ;;  %p219_p9 = scmp.ne.s32.totalorder %s1549_s28, %s1545_s27 }
  0x55   : > { %s2178_s30 = sadd.s32 4294967294, %s1597_s18   ;;  %p1856_p7 = por %p214_p3, %p213_p13 }
  0x56   : > { %p220_p6 = scmp.eq.s32.totalorder %s2178_s30, 7  ;;  %s304_s3 = sand.u32 1, %s1577_s13  }
  0x57   : > { %s1854_s19 = scalar_select %p201_p1, %s1553_s29, %s203_s22  }
  0x58   : > { %s2179_s15 = scalar_select %p1856_p7, 1, 0 }
  0x59   : > { %p1860_p11 = por %p220_p6, %p219_p9  ;;  %s1043_s25 = sshll.u32 %s1593_s17, 7 }
  0x5a   : > { %s1042_s14 = sshll.u32 %s304_s3, 3  ;;  %s2181_s1 = sld [smem:[#allocation33_spill]] }
  0x5b   : > { %s2180_s26 = scalar_select %p1860_p11, 1, 0 }
  0x5c   : > { %s308_s22 = scalar_lea.vmem [#allocation9], %s1042_s14  ;;  %p2182_p0 = scmp.lt.s32.totalorder %s1597_s18, 8 }
  0x5d   : > { %s315_s30 = sshll.u32 %s308_s22, 4  ;;  %s305_s7 = scalar_lea.sflag [#allocation10], %s304_s3  ;;  %s1882_s30 = int_to_ptr.vmem [resolvable:$true] %s315_s30 }
  0x5e   : > { %p1875_p6 = pnand %p2182_p0, %p1817_p5 }
  0x60   : > { %s1869_s16 = scalar_lea.hbm %s2181_s1, %s1043_s25  ;;  %p1357_p13 = pneg %p1875_p6 }
  0x61   : > { %s1355_s25 = scalar_lea.hbm %s1869_s16, 128  ;;  %s1360_s24 = scalar_lea.hbm %s2181_s1, 256 }
  0x62   : > { %p1356_p2 = scmp.ne.s32.totalorder %s1869_s16, %s1355_s25  ;;  %p1361_p5 = scmp.lt.u32.totalorder %s1869_s16, %s2181_s1 }
  0x63   : > { %p1362_p9 = scmp.lt.u32.totalorder %s1360_s24, %s1355_s25  ;;  %p1364_p11 = scmp.lt.u32.totalorder %s1355_s25, %s1869_s16 }
  0x64   : > { %p1358_p1 = pnand %p1357_p13, %p1356_p2 }
  0x65   : > { %p1363_p0 = por %p1362_p9, %p1361_p5 }
  0x66   : > { %p1359_p3 = pneg %p1358_p1 }
  0x67   : > { %p1365_p7 = por %p1364_p11, %p1363_p0 }
  0x69   : > { %p1366_p8 = pnand %p1365_p7, %p1359_p3 }
  0x6b   : > { %1369 = shalt.err (!%p1366_p8)
}
  0x6c   : > { %s1370_s3 = scalar_lea.vmem %s1882_s30, 128  ;;  %s1603_s21 = smov [#allocation9]  }
  0x6d   : > { %p1371_p2 = scmp.ne.s32.totalorder %s1882_s30, %s1370_s3  ;;  %s1375_s14 = sshll.u32 %s1603_s21, 4  ;;  %s1376_s14 = int_to_ptr.vmem [resolvable:$false] %s1375_s14 }
  0x6e   : > { %s1377_s17 = scalar_lea.vmem %s1376_s14, 256  ;;  %p1378_p12 = scmp.lt.s32.totalorder %s1882_s30, %s1376_s14 }
  0x6f   : > { %p1373_p1 = pnand %p1371_p2, %p1357_p13  ;;  %p1379_p5 = scmp.lt.s32.totalorder %s1377_s17, %s1370_s3 }
  0x71   : > { %p1374_p10 = pneg %p1373_p1  ;;  %p1380_p9 = por %p1379_p5, %p1378_p12 }
  0x73   : > { %p1381_p11 = pnand %p1380_p9, %p1374_p10 }
  0x75   : > { %1384 = shalt.err (!%p1381_p11)
}
  0x76   : > { %1155 = dma.hbm_to_vmem [thread:$0]  (!%p1875_p6), %s1869_s16, 128, %s1882_s30, %s305_s7  }
  0x77   : > { %s1385_s25 = scalar_lea.hbm %s1790_s2, 1024  ;;  %p2184_p7 = pneg %p1748_p4 }
  0x78   : > { %p1386_p8 = scmp.ne.s32.totalorder %s1790_s2, %s1385_s25  ;;  %s1390_s3 = scalar_lea.hbm %s2169_s4, 4096 }
  0x79   : > { %p1391_p12 = scmp.lt.u32.totalorder %s1790_s2, %s2169_s4  ;;  %p1392_p10 = scmp.lt.u32.totalorder %s1390_s3, %s1385_s25 }
  0x7a   : > { %p1388_p13 = pnand %p1386_p8, %p2184_p7  ;;  %p1394_p2 = scmp.lt.u32.totalorder %s1385_s25, %s1790_s2 }
  0x7b   : > { %p1393_p0 = por %p1392_p10, %p1391_p12 }
  0x7c   : > { %p1389_p3 = pneg %p1388_p13 }
  0x7d   : > { %p1395_p1 = por %p1394_p2, %p1393_p0 }
  0x7f   : > { %p1396_p5 = pnand %p1395_p1, %p1389_p3 }
  0x81   : > { %1399 = shalt.err (!%p1396_p5)
}
  0x82   : > { %s1400_s16 = scalar_lea.vmem %s1880_s8, 1024  ;;  %p2185_p9 = pmov %p2184_p7 }
  0x83   : > { %p1401_p6 = scmp.ne.s32.totalorder %s1880_s8, %s1400_s16  ;;  %s1604_s30 = smov [#allocation14]  }
  0x84   : > { %s1405_s7 = sshll.u32 %s1604_s30, 4  ;;  %s1406_s7 = int_to_ptr.vmem [resolvable:$false] %s1405_s7 }
  0x85   : > { %p1403_p11 = pnand %p1401_p6, %p2185_p9  ;;  %s1407_s14 = scalar_lea.vmem %s1406_s7, 2048 }
  0x86   : > { %p1408_p7 = scmp.lt.s32.totalorder %s1880_s8, %s1406_s7  ;;  %p1409_p13 = scmp.lt.s32.totalorder %s1407_s14, %s1400_s16 }
  0x87   : > { %p1404_p8 = pneg %p1403_p11 }
  0x88   : > { %p1410_p12 = por %p1409_p13, %p1408_p7 }
  0x8a   : > { %p1411_p10 = pnand %p1410_p12, %p1404_p8 }
  0x8c   : > { %1414 = shalt.err (!%p1411_p10)
}
  0x8d   : > { %s2186_s17 = smov 4   ;;  %s2187_s25 = smov 64  }
  0x8e   : > { %s2188_s24 = smov 256   ;;  %p2189_p3 = scmp.ne.s32.totalorder %s2170_s5, 0 }
  0x8f   : > { %1161 = dma.hbm_to_vmem [thread:$0]  (!%p1748_p4), %s1790_s2, 1024, %s1880_s8, %s1754_s20, %s2188_s24, %s2187_s25, %s2186_s17  }
  0x90   : > { %371 = sbr.rel (%p2189_p3) target bundleno = 1098 (0x44a), region = 44  ;;  %s373_s22 = sand.u32 (!%p2189_p3), 1, %s1573_s12  }
  0x91   : > { %s1049_s3 = sshll.u32 (!%p2189_p3), %s373_s22, 3  ;;  %s374_s21 = scalar_lea.sflag (!%p2189_p3), [#allocation10], %s373_s22 }
  0x92   : > { %s377_s10 = scalar_lea.vmem (!%p2189_p3), [#allocation9], %s1049_s3  ;;  %p2190_p0 = scmp.ne.s32.totalorder (!%p2189_p3), %s2173_s11, 0 }
  0x97   : > { %1528 = dma.done.wait (%p2190_p0), %s374_s21, 128  }
  0x98   : > { %1530 = vsyncadd (%p2190_p0), %s374_s21, 4294967168  ;;  %s382_s6 = sand.u32 1, %s1802_s0   ;;  %s384_s16 = sand.u32 1, %s1561_s9  }
  0x99   : > { %s1050_s8 = sshll.u32 %s384_s16, 6  ;;  %s383_s20 = scalar_lea.sflag [#allocation13], %s382_s6 }
  0x9a   : > { %s1945_s5 = scalar_lea.vmem [#allocation12], %s1050_s8  ;;  %p2191_p4 = scmp.ne.s32.totalorder %s2175_s23, 0 }
  0x9c   : > { %1532 = dma.done.wait (%p2191_p4), %s383_s20, 2048  }
  0x9d   : > { %1534 = vsyncadd (%p2191_p4), %s383_s20, 4294965248  ;;  %s2192_s2 = sld [smem:[#allocation25_spill]]  ;;  %s1952_s30 = sand.u32 1, %s1549_s28  }
  0x9e   : > { %s1052_s11 = sshll.u32 %s1952_s30, 3  ;;  %s2193_s17 = sld [smem:[#allocation32_spill]] }
  0x9f   : > { %s2194_s22 = sld [smem:[#allocation37_spill]]  ;;  %s2195_s16 = sld [smem:[#allocation40_spill]] }
  0xa0   : > { %s1971_s1 = scalar_lea.vmem [#allocation14], %s1050_s8  ;;  %s1973_s4 = scalar_lea.vmem [#allocation15], %s1052_s11 }
  0xa1   : > { %s2196_s13 = sld [smem:[#allocation24_spill]] }
  0xa3   : > { %p455_p2 = scmp.lt.s32.totalorder %s2192_s2, 1 }
  0xa5   : > { %s2233_s2 = smov (!%p455_p2, %s2192_s2), 1 }
  0xa6   : > { %s1957_s0 = sshll.u32 %s2233_s2, 3  ;;  %s1975_s2 = scalar_lea.vmem [#allocation16], %s1052_s11 }
  0xa7   : > { %s458_s25 = scalar_lea.vmem %s2193_s17, %s1957_s0  ;;  %s462_s3 = scalar_lea.vmem %s2194_s22, %s1957_s0 }
  0xa8   : > { %s466_s20 = scalar_lea.vmem %s2195_s16, %s1957_s0  ;;  %p1057_p1 = scmp.ne.s32.totalorder %s2196_s13, 0 }
  0xa9   : > { %v472_v0 = vld [vmem:[%s458_s25] sm:$0xff] (!%p1057_p1)  ;;  %v491_v2 = vld [vmem:[%s377_s10] sm:$0xff] (!%p1057_p1)  ;;  %vm494_vm0 = vcmask (!%p1057_p1), 7168   ;;  %v1605_v4 = vmov (!%p1057_p1), -inf   ;;  %v1606_v5 = vmov (!%p1057_p1), 0.0   ;;  %s2197_s11 = sld [smem:[#allocation34_spill]] (!%p1057_p1) }
  0xaa   : > { %471 = sbr.rel (%p1057_p1) target bundleno = 336 (0x150), region = 60  ;;  %v473_v1 = vmul.f32 (!%p1057_p1), %v472_v0, %v472_v0  ;;  %v492_v3 = vpack.c.bf16 (!%p1057_p1), %v491_v2, %v491_v2  ;;  %495 = vst.msk [vmem:[#allocation4] sm:$0xff] (!%p1057_p1), %vm494_vm0, %v1605_v4  ;;  %496 = vst.msk [vmem:[#allocation5] sm:$0xff] (!%p1057_p1), %vm494_vm0, %v1606_v5 }
  0xab   : > { %497 = vst.msk [vmem:[#allocation6] sm:$0xff] (!%p1057_p1), %vm494_vm0, %v1606_v5  ;;  %498 = vst.msk [vmem:[#allocation7] sm:$0xff] (!%p1057_p1), %vm494_vm0, %v1605_v4 }
  0xac   : > { %474 = vadd.xlane.f32.xlu0 (!%p1057_p1), %v473_v1  ;;  %493 = vst [vmem:[#allocation3] sm:$0xf] (!%p1057_p1), %v492_v3  ;;  %499 = vst.msk [vmem:[#allocation8] sm:$0xff] (!%p1057_p1), %vm494_vm0, %v1606_v5 }
  0xaf   : > { %v1058_v10 = vld [vmem:[%s2197_s11] ss:$0 sm:$0xff] (!%p1057_p1) }
 0x139   : > { %v475_v6 = vpop.xlane.xlu0 %474 }
 0x13a   : > { %v477_v7 = vmul.f32 0.0078125, %v475_v6 }
 0x13c   : > { %v478_v8 = vadd.f32 1e-05, %v477_v7 }
 0x13e   : > { %1291 = vrsqrt.f32 %v478_v8 }
 0x148   : > { %v1292_v9 = vpop.eup %1291 }
 0x149   : > { %v480_v11 = vmul.f32 %v1292_v9, %v472_v0 }
 0x14b   : > { %v488_v12 = vmul.f32 %v1058_v10, %v480_v11 }
 0x14d   : > { %v489_v13 = vpack.c.bf16 %v488_v12, %v488_v12 }
 0x14f   : > { %490 = vst [vmem:[#allocation2] sm:$0xf] %v489_v13 }
 0x150 PF: > { %v1295_v14 = vld [vmem:[%s1945_s5] sm:$0xff]   ;;  %v1607_v15 = vmov 0.0   ;;  %v1297_v17 = vld [vmem:[%s1945_s5 + $0x8] sm:$0xff]   ;;  %vm1608_vm1 = vmmov 0   ;;  %v1299_v19 = vld [vmem:[%s1945_s5 + $0x10] sm:$0xff]   ;;  %v1609_v42 = vmov 0  }
 0x151   : > { %1102 = vmatprep.subr.bf16.mxu0 %v1607_v15  ;;  %1122 = vmatprep.subr.bf16.mxu1 %v1607_v15  ;;  %v1296_v16 = vld [vmem:[%s1971_s1] sm:$0xff]   ;;  %v1298_v18 = vld [vmem:[%s1971_s1 + $0x8] sm:$0xff]   ;;  %v1300_v20 = vld [vmem:[%s1971_s1 + $0x10] sm:$0xff]   ;;  %vm732_vm2 = vcmask 7168  }
 0x152   : > { %1103 = vmatpush3.bf16.msra.mxu0 %v1295_v14  ;;  %1118 = vmatprep.mubr.msk.bf16.mxu0 %vm1608_vm1, %v1607_v15  ;;  %v1301_v21 = vld [vmem:[%s1945_s5 + $0x18] sm:$0xff]   ;;  %v1303_v23 = vld [vmem:[%s1945_s5 + $0x20] sm:$0xff]   ;;  %v1305_v25 = vld [vmem:[%s1945_s5 + $0x28] sm:$0xff]  }
 0x153   : > { %1123 = vmatpush3.bf16.msra.mxu1 %v1296_v16  ;;  %1104 = vmatprep.subr.bf16.mxu0 %v1607_v15  ;;  %v1302_v22 = vld [vmem:[%s1971_s1 + $0x18] sm:$0xff]   ;;  %v1304_v24 = vld [vmem:[%s1971_s1 + $0x20] sm:$0xff]   ;;  %v1306_v26 = vld [vmem:[%s1971_s1 + $0x28] sm:$0xff]  }
 0x154   : > { %1124 = vmatprep.subr.bf16.mxu1 %v1607_v15  ;;  %1138 = vmatprep.mubr.msk.bf16.mxu1 %vm1608_vm1, %v1607_v15  ;;  %v1307_v27 = vld [vmem:[%s1945_s5 + $0x30] sm:$0xff]   ;;  %v1309_v29 = vld [vmem:[%s1945_s5 + $0x38] sm:$0xff]   ;;  %v605_v32 = vld [vmem:[#allocation3] sm:$0xf] }
 0x155   : > { %v1308_v28 = vld [vmem:[%s1971_s1 + $0x30] sm:$0xff]   ;;  %v1310_v30 = vld [vmem:[%s1971_s1 + $0x38] sm:$0xff]   ;;  %1293 = vset.pattern.permute.xlu1 %v1609_v42  ;;  %1294 = vset.pattern.permute.xlu0 %v1609_v42  ;;  %v712_v43 = vld [vmem:[#allocation4] sm:$0xff]  ;;  %s2198_s1 = sld [smem:[#allocation24_spill]] }
 0x156   : > { %1105 = vmatpush3.bf16.msra.mxu0 %v1297_v17  ;;  %v500_v31 = vld [vmem:[#allocation2] sm:$0xf]  ;;  %v727_v63 = vld [vmem:[#allocation5] sm:$0xff]  ;;  %v734_v0 = vld [vmem:[#allocation6] sm:$0xff] }
 0x157   : > { %1125 = vmatpush3.bf16.msra.mxu1 %v1298_v18  ;;  %1106 = vmatprep.subr.bf16.mxu0 %v1607_v15  ;;  %v743_v46 = vld [vmem:[#allocation7] sm:$0xff]  ;;  %v750_v4 = vld [vmem:[#allocation8] sm:$0xff] }
 0x158   : > { %1126 = vmatprep.subr.bf16.mxu1 %v1607_v15 }
 0x15a   : > { %1107 = vmatpush3.bf16.msra.mxu0 %v1299_v19 }
 0x15b   : > { %1127 = vmatpush3.bf16.msra.mxu1 %v1300_v20  ;;  %1108 = vmatprep.subr.bf16.mxu0 %v1607_v15  ;;  %p1075_p5 = scmp.ne.s32.totalorder %s2198_s1, 3 }
 0x15c   : > { %1128 = vmatprep.subr.bf16.mxu1 %v1607_v15 }
 0x15e   : > { %1109 = vmatpush3.bf16.msra.mxu0 %v1301_v21 }
 0x15f   : > { %1129 = vmatpush3.bf16.msra.mxu1 %v1302_v22  ;;  %1110 = vmatprep.subr.bf16.mxu0 %v1607_v15 }
 0x160   : > { %1130 = vmatprep.subr.bf16.mxu1 %v1607_v15 }
 0x162   : > { %1111 = vmatpush3.bf16.msra.mxu0 %v1303_v23 }
 0x163   : > { %1131 = vmatpush3.bf16.msra.mxu1 %v1304_v24  ;;  %1112 = vmatprep.subr.bf16.mxu0 %v1607_v15 }
 0x164   : > { %1132 = vmatprep.subr.bf16.mxu1 %v1607_v15 }
 0x166   : > { %1113 = vmatpush3.bf16.msra.mxu0 %v1305_v25 }
 0x167   : > { %1133 = vmatpush3.bf16.msra.mxu1 %v1306_v26  ;;  %1114 = vmatprep.subr.bf16.mxu0 %v1607_v15  ;;  %v784_v26 = vld [vmem:[%s462_s3] sm:$0xff] (!%p1075_p5) }
 0x168   : > { %1134 = vmatprep.subr.bf16.mxu1 %v1607_v15 }
 0x16a   : > { %1115 = vmatpush3.bf16.msra.mxu0 %v1307_v27 }
 0x16b   : > { %1135 = vmatpush3.bf16.msra.mxu1 %v1308_v28  ;;  %1116 = vmatprep.subr.bf16.mxu0 %v1607_v15 }
 0x16c   : > { %1136 = vmatprep.subr.bf16.mxu1 %v1607_v15 }
 0x16e   : > { %1117 = vmatpush3.bf16.msra.mxu0 %v1309_v29 }
 0x16f   : > { %1137 = vmatpush3.bf16.msra.mxu1 %v1310_v30 }
 0x171   : > { %1119 = vmatmul.mubr.bf16.vlgmr.msra.gmra.mrb[0].mxu0 %v500_v31 }
 0x172   : > { %1139 = vmatmul.mubr.bf16.vlgmr.msra.gmra.mrb[0].mxu1 %v605_v32 }
 0x244   : > { %v599_v33 = vpop.f32.mrb[0].mxu0 }
 0x245   : > { %710 = vst [vmem:[%s1973_s4] sm:$0xff] %v599_v33  ;;  %v704_v34 = vpop.f32.mrb[0].mxu1  ;;  %v1120_v35 = vpop.f32.mrb[1].mxu0 }
 0x246   : > { %711 = vst [vmem:[%s1975_s2] sm:$0xff] %v704_v34  ;;  %713 = vmax.xlane.f32.xlu0 %v704_v34  ;;  %v1140_v36 = vpop.f32.mrb[1].mxu1  ;;  %v602_v37 = vpop.f32.mrb[2].mxu0  ;;  %v736_v38 = vsub.f32 %v704_v34, %v599_v33 }
 0x247   : > { %v707_v39 = vpop.f32.mrb[2].mxu1  ;;  %v1121_v40 = vpop.f32.mrb[3].mxu0 }
 0x248   : > { %v1141_v41 = vpop.f32.mrb[3].mxu1 }
 0x24a   : > { %744 = vmax.xlane.f32.xlu0 %v599_v33 }
 0x2d3   : > { %v714_v44 = vpop.xlane.xlu0 %713 }
 0x2d4   : > { %v715_v45 = vmax.f32 %v712_v43, %v714_v44 }
 0x2d6   : > { %v716_v47 = vsub.f32 %v712_v43, %v715_v45  ;;  %742 = vst.msk [vmem:[#allocation4] sm:$0xff] %vm732_vm2, %v715_v45  ;;  %721 = vperm.xlu1 %1293, %v715_v45  }
 0x2d7   : > { %v745_v48 = vpop.xlane.xlu0 %744 }
 0x2d8   : > { %v746_v49 = vmax.f32 %v743_v46, %v745_v48  ;;  %v717_v60 = vmul.f32 1.442695, %v716_v47 }
 0x2da   : > { %v747_v50 = vsub.f32 %v743_v46, %v746_v49  ;;  %764 = vst.msk [vmem:[#allocation7] sm:$0xff] %vm732_vm2, %v746_v49  ;;  %754 = vperm.xlu1 %1293, %v746_v49  }
 0x2dc   : > { %v748_v61 = vmul.f32 1.442695, %v747_v50 }
 0x2dd   : > { %v769_v15 = vld [vmem:[#allocation4] sm:$0xff] (!%p1075_p5) }
 0x2e1   : > { %v774_v19 = vld [vmem:[#allocation7] sm:$0xff] (!%p1075_p5) }
 0x355   : > { %v722_v51 = vpop.permute.xlu1 %721 }
 0x356   : > { %v724_v52 = vsub.f32 %v704_v34, %v722_v51 }
 0x358   : > { %v725_v53 = vmul.f32 1.442695, %v724_v52 }
 0x359   : > { %v755_v54 = vpop.permute.xlu1 %754 }
 0x35a   : > { %1311 = vpow2.f32 %v725_v53  ;;  %v757_v55 = vsub.f32 %v599_v33, %v755_v54 }
 0x35c   : > { %v758_v56 = vmul.f32 1.442695, %v757_v55 }
 0x35e   : > { %1313 = vpow2.f32 %v758_v56 }
 0x35f   : > { %1315 = vpow2.f32 %v717_v60 }
 0x360   : > { %1317 = vpow2.f32 %v748_v61 }
 0x364   : > { %v1312_v57 = vpop.eup %1311 }
 0x365   : > { %729 = vadd.xlane.f32.xlu0 %v1312_v57  ;;  %v737_v58 = vmul.f32 %v1312_v57, %v736_v38 }
 0x367   : > { %738 = vadd.xlane.f32.xlu1 %v737_v58 }
 0x368   : > { %v1314_v59 = vpop.eup %1313 }
 0x369   : > { %760 = vadd.xlane.f32.xlu0 %v1314_v59  ;;  %v1316_v62 = vpop.eup %1315 }
 0x36a   : > { %v728_v1 = vmul.f32 %v1316_v62, %v727_v63  ;;  %v1318_v2 = vpop.eup %1317  ;;  %v735_v6 = vmul.f32 %v1316_v62, %v734_v0 }
 0x36b   : > { %v751_v9 = vmul.f32 %v1318_v2, %v750_v4 }
 0x3f2   : > { %v730_v3 = vpop.xlane.xlu0 %729 }
 0x3f3   : > { %v731_v5 = vadd.f32 %v730_v3, %v728_v1  ;;  %768 = sbr.rel (%p1075_p5) target bundleno = 1046 (0x416), region = 64 }
 0x3f4   : > { %v739_v7 = vpop.xlane.xlu1 %738 }
 0x3f5   : > { %733 = vst.msk [vmem:[#allocation5] sm:$0xff] %vm732_vm2, %v731_v5  ;;  %v740_v8 = vadd.f32 %v739_v7, %v735_v6 }
 0x3f6   : > { %v761_v10 = vpop.xlane.xlu0 %760 }
 0x3f7   : > { %741 = vst.msk [vmem:[#allocation6] sm:$0xff] %vm732_vm2, %v740_v8  ;;  %v762_v11 = vadd.f32 %v761_v10, %v751_v9 }
 0x3f9   : > { %763 = vst.msk [vmem:[#allocation8] sm:$0xff] %vm732_vm2, %v762_v11 }
 0x3fc   : > { %v770_v12 = vld [vmem:[#allocation5] sm:$0xff] }
 0x3fd   : > { %1319 = vlog2.f32 %v770_v12 }
 0x3fe   : > { %v779_v16 = vld [vmem:[#allocation6] sm:$0xff] }
 0x400   : > { %v775_v13 = vld [vmem:[#allocation8] sm:$0xff] }
 0x401   : > { %1321 = vlog2.f32 %v775_v13 }
 0x402   : > { %1323 = vrcp.f32 %v770_v12 }
 0x407   : > { %v1320_v14 = vpop.eup %1319 }
 0x408   : > { %v772_v18 = vmul.f32 0.6931472, %v1320_v14 }
 0x40a   : > { %v773_v22 = vadd.f32 %v772_v18, %v769_v15 }
 0x40b   : > { %v1322_v17 = vpop.eup %1321 }
 0x40c   : > { %v1324_v20 = vpop.eup %1323  ;;  %v777_v21 = vmul.f32 0.6931472, %v1322_v17 }
 0x40d   : > { %v781_v23 = vmul.f32 %v1324_v20, %v779_v16 }
 0x40e   : > { %v778_v24 = vadd.f32 %v777_v21, %v774_v19 }
 0x40f   : > { %v782_v25 = vsub.f32 %v781_v23, %v773_v22 }
 0x411   : > { %v783_v27 = vadd.f32 %v782_v25, %v778_v24 }
 0x413   : > { %v785_v28 = vmul.f32 %v784_v26, %v783_v27 }
 0x415   : > { %786 = vst.msk [vmem:[%s466_s20] sm:$0xff] %vm732_vm2, %v785_v28 }
 0x416 PF: > { %s2201_s23 = sld [smem:[#allocation25_spill]]  ;;  %s2202_s24 = sld [smem:[#allocation24_spill]] }
 0x417   : > { %s812_s3 = sshll.u32 %s1973_s4, 4  ;;  %s2203_s0 = sld [smem:[#allocation38_spill]]  ;;  %s2022_s3 = int_to_ptr.vmem [resolvable:$true] %s812_s3 }
 0x418   : > { %s788_s8 = scalar_lea.sflag [#allocation11], %s1952_s30  ;;  %s1415_s11 = scalar_lea.vmem %s2022_s3, 128 }
 0x419   : > { %p1416_p6 = scmp.ne.s32.totalorder %s2022_s3, %s1415_s11  ;;  %p2204_p9 = scmp.ne.s32.totalorder %s2179_s15, 0 }
 0x41a   : > { %s1610_s1 = smov [#allocation15]  }
 0x41b   : > { %p1417_p11 = pnand %p1416_p6, %p2204_p9  ;;  %s1419_s10 = sshll.u32 %s1610_s1, 4  ;;  %s1420_s10 = int_to_ptr.vmem [resolvable:$false] %s1419_s10 }
 0x41c   : > { %s1078_s22 = sshll.u32 %s2201_s23, 2  ;;  %s1421_s4 = scalar_lea.vmem %s1420_s10, 256 }
 0x41d   : > { %s2018_s21 = sadd.s32 %s2202_s24, %s1078_s22  ;;  %p1418_p8 = pneg %p1417_p11 }
 0x41e   : > { %s1079_s6 = sshll.u32 %s2018_s21, 7  ;;  %p1422_p7 = scmp.lt.s32.totalorder %s2022_s3, %s1420_s10 }
 0x41f   : > { %s810_s20 = scalar_lea.hbm %s2203_s0, %s1079_s6  ;;  %p1423_p13 = scmp.lt.s32.totalorder %s1421_s4, %s1415_s11 }
 0x421   : > { %p1424_p12 = por %p1423_p13, %p1422_p7 }
 0x423   : > { %p1425_p10 = pnand %p1424_p12, %p1418_p8 }
 0x425   : > { %1428 = shalt.err (!%p1425_p10)
}
 0x426   : > { %s1429_s5 = scalar_lea.hbm %s810_s20, 128  ;;  %s1433_s17 = scalar_lea.hbm %s2203_s0, 1024 }
 0x427   : > { %p1430_p3 = scmp.ne.s32.totalorder %s810_s20, %s1429_s5  ;;  %p1434_p2 = scmp.lt.u32.totalorder %s810_s20, %s2203_s0 }
 0x428   : > { %p1435_p1 = scmp.lt.u32.totalorder %s1433_s17, %s1429_s5  ;;  %p1437_p6 = scmp.lt.u32.totalorder %s1429_s5, %s810_s20 }
 0x429   : > { %p1431_p0 = pnand %p1430_p3, %p2204_p9 }
 0x42a   : > { %p1436_p5 = por %p1435_p1, %p1434_p2 }
 0x42b   : > { %p1432_p4 = pneg %p1431_p0 }
 0x42c   : > { %p1438_p11 = por %p1437_p6, %p1436_p5 }
 0x42e   : > { %p1439_p8 = pnand %p1438_p11, %p1432_p4 }
 0x430   : > { %1442 = shalt.err (!%p1439_p8)
}
 0x431   : > { %1148 = dma.vmem_to_hbm [thread:$0]  (%p2204_p9), %s2022_s3, 128, %s810_s20, %s788_s8  }
 0x432   : > { %s2205_s16 = sld [smem:[#allocation39_spill]]  ;;  %s827_s11 = sshll.u32 %s1975_s2, 4  ;;  %s828_s11 = int_to_ptr.vmem [resolvable:$true] %s827_s11 }
 0x433   : > { %s793_s10 = scalar_lea.sflag [#allocation17], %s1952_s30  ;;  %s1443_s4 = scalar_lea.vmem %s828_s11, 128 }
 0x434   : > { %p1444_p7 = scmp.ne.s32.totalorder %s828_s11, %s1443_s4  ;;  %s1611_s5 = smov [#allocation16]  }
 0x435   : > { %s1447_s7 = sshll.u32 %s1611_s5, 4  ;;  %s1448_s7 = int_to_ptr.vmem [resolvable:$false] %s1447_s7 }
 0x436   : > { %p1445_p13 = pnand %p1444_p7, %p2204_p9  ;;  %s1449_s14 = scalar_lea.vmem %s1448_s7, 256 }
 0x437   : > { %p1450_p10 = scmp.lt.s32.totalorder %s828_s11, %s1448_s7  ;;  %p1451_p3 = scmp.lt.s32.totalorder %s1449_s14, %s1443_s4 }
 0x438   : > { %s2206_s1 = smov %s2205_s16  ;;  %s2051_s13 = scalar_lea.hbm %s2205_s16, %s1079_s6 }
 0x439   : > { %p1446_p12 = pneg %p1445_p13  ;;  %p1452_p0 = por %p1451_p3, %p1450_p10 }
 0x43b   : > { %p1453_p4 = pnand %p1452_p0, %p1446_p12 }
 0x43d   : > { %1456 = shalt.err (!%p1453_p4)
}
 0x43e   : > { %s1457_s30 = scalar_lea.hbm %s2051_s13, 128  ;;  %s1461_s3 = scalar_lea.hbm %s2206_s1, 1024 }
 0x43f   : > { %p1458_p2 = scmp.ne.s32.totalorder %s2051_s13, %s1457_s30  ;;  %p1462_p6 = scmp.lt.u32.totalorder %s2051_s13, %s2206_s1 }
 0x440   : > { %p1463_p11 = scmp.lt.u32.totalorder %s1461_s3, %s1457_s30  ;;  %p1465_p7 = scmp.lt.u32.totalorder %s1457_s30, %s2051_s13 }
 0x441   : > { %p1459_p1 = pnand %p1458_p2, %p2204_p9 }
 0x442   : > { %p1464_p8 = por %p1463_p11, %p1462_p6 }
 0x443   : > { %p1460_p5 = pneg %p1459_p1 }
 0x444   : > { %p1466_p13 = por %p1465_p7, %p1464_p8 }
 0x446   : > { %p1467_p12 = pnand %p1466_p13, %p1460_p5 }
 0x448   : > { %1470 = shalt.err (!%p1467_p12)
}
 0x449   : > { %1149 = dma.vmem_to_hbm [thread:$0]  (%p2204_p9), %s828_s11, 128, %s2051_s13, %s793_s10  }
 0x44a PF: > { %p1170_p10 = scmp.ge.s32.totalorder %s1597_s18, 2  ;;  %s842_s8 = sand.u32 1, %s1545_s27  }
 0x44b   : > { %p2207_p3 = scmp.ne.s32.totalorder %s2180_s26, 0  ;;  %s843_s17 = scalar_lea.sflag [#allocation11], %s842_s8 }
 0x44d   : > { %p1163_p0 = pnand %p1170_p10, %p2207_p3 }
 0x44f   : > { %1536 = dma.done.wait (!%p1163_p0), %s843_s17, 128  }
 0x450   : > { %1538 = vsyncadd (!%p1163_p0), %s843_s17, 4294967168  ;;  %s852_s25 = scalar_lea.sflag [#allocation17], %s842_s8 }
 0x451   : > { %1540 = dma.done.wait (!%p1163_p0), %s852_s25, 128  }
 0x452   : > { %1542 = vsyncadd (!%p1163_p0), %s852_s25, 4294967168  ;;  %s31_s18 = sadd.s32 1, %s1597_s18   ;;  %s2209_s23 = sld [smem:[#allocation22_spill]] }
 0x453   : > { %p2077_p4 = scmp.ge.s32.totalorder %s31_s18, 10   ;;  %s2210_s10 = sld [smem:[#allocation30_spill]] }
 0x454   : > { %s2211_s26 = sld [smem:[#allocation23_spill]]  ;;  %s2212_s13 = sld [smem:[#allocation31_spill]] }
 0x455   : > { %s2213_s14 = sld [smem:[#allocation26_spill]]  ;;  %s2214_s24 = sld [smem:[#allocation27_spill]] }
 0x456   : > { %s2215_s16 = sld [smem:[#allocation28_spill]]  ;;  %s2216_s17 = sld [smem:[#allocation29_spill]] }
 0x457   : > { %s2218_s27 = smov %s1549_s28  ;;  %s2219_s28 = smov %s1553_s29 }
 0x458   : > { %s2220_s29 = smov %s1854_s19  ;;  %s2221_s30 = smov %s1561_s9 }
 0x459   : > { %s2222_s9 = smov %s2209_s23  ;;  %s2223_s11 = smov %s1573_s12 }
 0x45a   : > { %s2224_s12 = smov %s2211_s26  ;;  %30 = sbr.rel (!%p2077_p4) target bundleno = 24 (0x18), region = 156 }
 0x45b   : > { %s2225_s15 = smov %s2214_s24 }
 0x461   :  { %864 = vsyncpa [#allocation10], 1 }
 0x462   :  { %866 = vsyncpa [#allocation10 + $0x1], 1 }
 0x463   :  { %867 = vsyncpa [#allocation13], 1 }
 0x464   :  { %869 = vsyncpa [#allocation13 + $0x1], 1 }
 0x465   :  { %870 = vsyncpa [#allocation11], 1 }
 0x466   :  { %872 = vsyncpa [#allocation11 + $0x1], 1 }
 0x467   :  { %873 = vsyncpa [#allocation17], 1 }
 0x468   :  { %875 = vsyncpa [#allocation17 + $0x1], 1 }

</bundles_post_ra>
